<compile_context>
chip_gen: v7x
topology: tpu7x:2x2x1
jax: 0.10.0
libtpu: 0.0.40
codegen_flags: <defaults>
</compile_context>

<pallas_src>
import jax
import jax.numpy as jnp
from jax.experimental import pallas as pl
from jax.experimental.pallas import tpu as pltpu


# ----------------------------- helpers ---------------------------------------


def _block_diag(a, b):
    """[[a, 0], [0, b]] without external deps."""
    za = jnp.zeros((a.shape[0], b.shape[1]), a.dtype)
    zb = jnp.zeros((b.shape[0], a.shape[1]), b.dtype)
    top = jnp.concatenate([a, za], axis=1)
    bot = jnp.concatenate([zb, b], axis=1)
    return jnp.concatenate([top, bot], axis=0)


def _round_up(x, m):
    return ((x + m - 1) // m) * m


# ----------------------------- kernel ----------------------------------------


def critic_embed_kernel(xo_ref, xa_ref, wo_ref, wa_ref, be_ref,
                        w1_ref, b1_ref, w2_ref, b2_ref, w3_ref, b3_ref,
                        q_ref):
    mm_dtype = wo_ref.dtype  # bf16 by default (f32 fallback supported)

    # Activations streamed as f32; cast to the matmul dtype in-kernel (cheap
    # VPU work, avoids an extra HBM copy of the activation stream).
    xo = xo_ref[...].astype(mm_dtype)   # (row_tile, obs_dim)
    xa = xa_ref[...].astype(mm_dtype)   # (row_tile, act_dim)

    # Fused embedders without a concat: Wo/Wa are zero-padded to the full
    # (Eo+Ea) output width, so xo@Wo_wide + xa@Wa_wide == concat(eo, ea).
    e = (jnp.dot(xo, wo_ref[...], preferred_element_type=jnp.float32)
         + jnp.dot(xa, wa_ref[...], preferred_element_type=jnp.float32))
    e = jnp.maximum(e + be_ref[...], 0.0)                       # f32 bias/ReLU

    # Fused critic heads: W1 = [W1_h1 | W1_h2], W2/W3 block-diagonal.
    h1 = jnp.maximum(
        jnp.dot(e.astype(mm_dtype), w1_ref[...],
                preferred_element_type=jnp.float32) + b1_ref[...], 0.0)
    h2 = jnp.maximum(
        jnp.dot(h1.astype(mm_dtype), w2_ref[...],
                preferred_element_type=jnp.float32) + b2_ref[...], 0.0)

    # (row_tile, 2): column 0 = q1, column 1 = q2.  Single merged store.
    q_ref[...] = (jnp.dot(h2.astype(mm_dtype), w3_ref[...],
                          preferred_element_type=jnp.float32) + b3_ref[...])


# ----------------------------- wrapper ----------------------------------------


def critic_embed_forward(observs, current_actions, fused_params, *,
                         max_row_tile=2048):
    """observs: (T, B, obs_dim), current_actions: (T, B, action_dim).

    Returns (q1, q2), each (T, B, 1), matching the PyTorch module.
    """
    T, B, obs_dim = observs.shape
    action_dim = current_actions.shape[-1]
    N = T * B

    # Two separate activation streams (no host-side concat -> no extra HBM copy).
    xo = observs.reshape(N, obs_dim).astype(jnp.float32)
    xa = current_actions.reshape(N, action_dim).astype(jnp.float32)

    # Balanced row tiles: padding capped at <8 rows per tile; >=2 grid steps
    # whenever N allows so v7x's two TensorCores both get work ("parallel").
    num_tiles = pl.cdiv(N, max_row_tile)
    if N >= 16:
        num_tiles = max(num_tiles, 2)
    row_tile = _round_up(pl.cdiv(N, num_tiles), 8)
    Np = num_tiles * row_tile
    if Np != N:
        xo = jnp.pad(xo, ((0, Np - N), (0, 0)))
        xa = jnp.pad(xa, ((0, Np - N), (0, 0)))

    (wo, wa, be, w1, b1, w2, b2, w3, b3) = fused_params
    weights = (wo, wa, be, w1, b1, w2, b2, w3, b3)

    def row_spec(feat):
        return pl.BlockSpec((row_tile, feat), lambda i: (i, 0))

    def full_spec(arr):
        return pl.BlockSpec(arr.shape, lambda i: (0, 0))

    e_dim, h1_dim, h2_dim = be.shape[-1], b1.shape[-1], b2.shape[-1]
    flops = 2 * N * (obs_dim * e_dim + action_dim * e_dim
                     + e_dim * h1_dim + h1_dim * h2_dim + h2_dim * 2)
    bytes_accessed = (N * (obs_dim + action_dim) * 4        # activations in
                      + N * 2 * 4                           # merged q out
                      + sum(int(w.size) * w.dtype.itemsize for w in weights))

    q = pl.pallas_call(
        critic_embed_kernel,
        out_shape=jax.ShapeDtypeStruct((Np, 2), jnp.float32),
        grid=(num_tiles,),
        in_specs=[row_spec(obs_dim), row_spec(action_dim)]
                 + [full_spec(w) for w in weights],
        out_specs=row_spec(2),
        compiler_params=pltpu.CompilerParams(
            dimension_semantics=("parallel",),
            vmem_limit_bytes=32 * 1024 * 1024,
        ),
        cost_estimate=pl.CostEstimate(
            flops=flops, transcendentals=0, bytes_accessed=bytes_accessed),
    )(xo, xa, *weights)

    q1 = q[:N, 0:1].reshape(T, B, 1)
    q2 = q[:N, 1:2].reshape(T, B, 1)
    return q1, q2


# ----------------------------- param init / fusion ---------------------------


def init_params(key, obs_dim, action_dim, obs_embed, act_embed, hidden_dims):
    """Deterministic synthetic parameters mirroring the PyTorch module layout."""
    def dense(k, fan_in, fan_out):
        kw, kb = jax.random.split(k)
        scale = 1.0 / jnp.sqrt(jnp.float32(fan_in))
        w = jax.random.uniform(kw, (fan_in, fan_out), jnp.float32, -scale, scale)
        b = jax.random.uniform(kb, (1, fan_out), jnp.float32, -scale, scale)
        return w, b

    ks = jax.random.split(key, 4)
    wo, bo = dense(ks[0], obs_dim, obs_embed)       # observ_embedder
    wa, ba = dense(ks[1], action_dim, act_embed)    # action_embedder

    in_dim = obs_embed + act_embed
    h1d, h2d = hidden_dims

    def critic_head(k):
        k1, k2, k3 = jax.random.split(k, 3)
        w1, b1 = dense(k1, in_dim, h1d)
        w2, b2 = dense(k2, h1d, h2d)
        w3, b3 = dense(k3, h2d, 1)
        return (w1, b1, w2, b2, w3, b3)

    return {
        "wo": wo, "bo": bo, "wa": wa, "ba": ba,
        "q1": critic_head(ks[2]),
        "q2": critic_head(ks[3]),
    }


def fuse_params(raw, *, matmul_dtype=jnp.bfloat16):
    """Fold concat + the two critic heads into wide weight matrices.

    Matmul weights are stored in `matmul_dtype` (bf16 for MXU throughput);
    biases stay f32 (bias/ReLU are computed in f32 in the kernel).
    """
    wo, bo, wa, ba = raw["wo"], raw["bo"], raw["wa"], raw["ba"]
    w1_1, b1_1, w2_1, b2_1, w3_1, b3_1 = raw["q1"]
    w1_2, b1_2, w2_2, b2_2, w3_2, b3_2 = raw["q2"]

    eo, ea = wo.shape[1], wa.shape[1]
    # Zero-pad Wo/Wa along the OUTPUT dim (not K): the two embedder matmuls
    # then sum into one (rows, Eo+Ea) embedding with no concat anywhere.
    wo_wide = jnp.concatenate([wo, jnp.zeros((wo.shape[0], ea), wo.dtype)], axis=1)
    wa_wide = jnp.concatenate([jnp.zeros((wa.shape[0], eo), wa.dtype), wa], axis=1)
    be = jnp.concatenate([bo, ba], axis=1)               # (1, Eo+Ea)

    w1 = jnp.concatenate([w1_1, w1_2], axis=1)           # (Eo+Ea, 2*h1)
    b1 = jnp.concatenate([b1_1, b1_2], axis=1)           # (1, 2*h1)
    w2 = _block_diag(w2_1, w2_2)                         # (2*h1, 2*h2)
    b2 = jnp.concatenate([b2_1, b2_2], axis=1)           # (1, 2*h2)
    w3 = _block_diag(w3_1, w3_2)                         # (2*h2, 2)
    b3 = jnp.concatenate([b3_1, b3_2], axis=1)           # (1, 2)

    md = matmul_dtype
    return (wo_wide.astype(md), wa_wide.astype(md), be.astype(jnp.float32),
            w1.astype(md), b1.astype(jnp.float32),
            w2.astype(md), b2.astype(jnp.float32),
            w3.astype(md), b3.astype(jnp.float32))


# ----------------------------- pure-JAX reference -----------------------------


def reference_forward(observs, current_actions, raw):
    eo = jax.nn.relu(observs @ raw["wo"] + raw["bo"])
    ea = jax.nn.relu(current_actions @ raw["wa"] + raw["ba"])
    x = jnp.concatenate([eo, ea], axis=-1)

    def head(p):
        w1, b1, w2, b2, w3, b3 = p
        h = jax.nn.relu(x @ w1 + b1)
        h = jax.nn.relu(h @ w2 + b2)
        return h @ w3 + b3

    return head(raw["q1"]), head(raw["q2"])


# ----------------------------- main -------------------------------------------


if __name__ == "__main__":
    T, B = 8, 2
    obs_dim, action_dim = 16, 4
    obs_embed, act_embed = 32, 32
    hidden_dims = (32, 32)

    key = jax.random.PRNGKey(0)
    k_obs, k_act, k_params = jax.random.split(key, 3)

    observs = jax.random.normal(k_obs, (T, B, obs_dim), jnp.float32)
    current_actions = jax.random.normal(k_act, (T, B, action_dim), jnp.float32)

    raw = init_params(k_params, obs_dim, action_dim,
                      obs_embed, act_embed, hidden_dims)
    fused = fuse_params(raw)          # bf16 matmul weights, f32 biases

    q1, q2 = critic_embed_forward(observs, current_actions, fused)
    jax.block_until_ready((q1, q2))

    # sanity check against a pure-JAX f32 reference of the original (unfused)
    # net; tolerance relaxed because the kernel's MXU operands are bf16.
    r1, r2 = reference_forward(observs, current_actions, raw)
    assert q1.shape == (T, B, 1) and q2.shape == (T, B, 1)
    assert jnp.allclose(q1, r1, rtol=5e-2, atol=5e-2), \
        float(jnp.max(jnp.abs(q1 - r1)))
    assert jnp.allclose(q2, r2, rtol=5e-2, atol=5e-2), \
        float(jnp.max(jnp.abs(q2 - r2)))

    # TODO(synk): image_encoder path (CNN observation embedder) is not
    # implemented; only the vector-observation FeatureExtractor path is covered.

    print("KERNEL_OK")
</pallas_src>

<mosaic_0001>
module attributes {stable_mosaic.version = 11 : i64} {
  func.func @critic_embed_kernel(%arg0: i32, %arg1: memref<8x16xf32, #tpu.memory_space<vmem>>, %arg2: memref<8x4xf32, #tpu.memory_space<vmem>>, %arg3: memref<16x64xbf16, #tpu.memory_space<vmem>>, %arg4: memref<4x64xbf16, #tpu.memory_space<vmem>>, %arg5: memref<1x64xf32, #tpu.memory_space<vmem>>, %arg6: memref<64x64xbf16, #tpu.memory_space<vmem>>, %arg7: memref<1x64xf32, #tpu.memory_space<vmem>>, %arg8: memref<64x64xbf16, #tpu.memory_space<vmem>>, %arg9: memref<1x64xf32, #tpu.memory_space<vmem>>, %arg10: memref<64x2xbf16, #tpu.memory_space<vmem>>, %arg11: memref<1x2xf32, #tpu.memory_space<vmem>>, %arg12: memref<8x2xf32, #tpu.memory_space<vmem>>) attributes {dimension_semantics = [#tpu.dimension_semantics<parallel>], iteration_bounds = array<i64: 2>, scalar_prefetch = 0 : i64, scratch_operands = 0 : i64, tpu.core_type = #tpu.core_type<tc>, window_params = [{transform_indices = @transform_0, window_bounds = array<i64: 8, 16>}, {transform_indices = @transform_1, window_bounds = array<i64: 8, 4>}, {pipeline_mode = #tpu.pipeline_mode<synchronous>, transform_indices = @transform_2, window_bounds = array<i64: 16, 64>}, {pipeline_mode = #tpu.pipeline_mode<synchronous>, transform_indices = @transform_3, window_bounds = array<i64: 4, 64>}, {pipeline_mode = #tpu.pipeline_mode<synchronous>, transform_indices = @transform_4, window_bounds = array<i64: 1, 64>}, {pipeline_mode = #tpu.pipeline_mode<synchronous>, transform_indices = @transform_5, window_bounds = array<i64: 64, 64>}, {pipeline_mode = #tpu.pipeline_mode<synchronous>, transform_indices = @transform_6, window_bounds = array<i64: 1, 64>}, {pipeline_mode = #tpu.pipeline_mode<synchronous>, transform_indices = @transform_7, window_bounds = array<i64: 64, 64>}, {pipeline_mode = #tpu.pipeline_mode<synchronous>, transform_indices = @transform_8, window_bounds = array<i64: 1, 64>}, {pipeline_mode = #tpu.pipeline_mode<synchronous>, transform_indices = @transform_9, window_bounds = array<i64: 64, 2>}, {pipeline_mode = #tpu.pipeline_mode<synchronous>, transform_indices = @transform_10, window_bounds = array<i64: 1, 2>}, {transform_indices = @transform_11, window_bounds = array<i64: 8, 2>}]} {
    %c0 = arith.constant 0 : index
    %c0_0 = arith.constant 0 : index
    %0 = vector.load %arg1[%c0, %c0_0] : memref<8x16xf32, #tpu.memory_space<vmem>>, vector<8x16xf32>
    %1 = arith.truncf %0 : vector<8x16xf32> to vector<8x16xbf16>
    %c0_1 = arith.constant 0 : index
    %c0_2 = arith.constant 0 : index
    %2 = vector.load %arg2[%c0_1, %c0_2] : memref<8x4xf32, #tpu.memory_space<vmem>>, vector<8x4xf32>
    %3 = arith.truncf %2 : vector<8x4xf32> to vector<8x4xbf16>
    %c0_3 = arith.constant 0 : index
    %c0_4 = arith.constant 0 : index
    %4 = vector.load %arg3[%c0_3, %c0_4] : memref<16x64xbf16, #tpu.memory_space<vmem>>, vector<16x64xbf16>
    %cst = arith.constant dense<0.000000e+00> : vector<8x64xf32>
    %5 = tpu.matmul %1, %4, %cst {dimension_numbers = #tpu.dot_dimension_numbers<[1], [0], [0], [1], [0, 0, 1, 1], [], []>} : vector<8x16xbf16>, vector<16x64xbf16>, vector<8x64xf32> -> vector<8x64xf32>
    %c0_5 = arith.constant 0 : index
    %c0_6 = arith.constant 0 : index
    %6 = vector.load %arg4[%c0_5, %c0_6] : memref<4x64xbf16, #tpu.memory_space<vmem>>, vector<4x64xbf16>
    %cst_7 = arith.constant dense<0.000000e+00> : vector<8x64xf32>
    %7 = tpu.matmul %3, %6, %cst_7 {dimension_numbers = #tpu.dot_dimension_numbers<[1], [0], [0], [1], [0, 0, 1, 1], [], []>} : vector<8x4xbf16>, vector<4x64xbf16>, vector<8x64xf32> -> vector<8x64xf32>
    %8 = arith.addf %5, %7 : vector<8x64xf32>
    %c0_8 = arith.constant 0 : index
    %c0_9 = arith.constant 0 : index
    %9 = vector.load %arg5[%c0_8, %c0_9] : memref<1x64xf32, #tpu.memory_space<vmem>>, vector<1x64xf32>
    %10 = vector.broadcast %9 : vector<1x64xf32> to vector<8x64xf32>
    %11 = arith.addf %8, %10 : vector<8x64xf32>
    %cst_10 = arith.constant 0.000000e+00 : f32
    %12 = vector.broadcast %cst_10 : f32 to vector<8x64xf32>
    %13 = arith.maximumf %11, %12 : vector<8x64xf32>
    %14 = arith.truncf %13 : vector<8x64xf32> to vector<8x64xbf16>
    %c0_11 = arith.constant 0 : index
    %c0_12 = arith.constant 0 : index
    %15 = vector.load %arg6[%c0_11, %c0_12] : memref<64x64xbf16, #tpu.memory_space<vmem>>, vector<64x64xbf16>
    %cst_13 = arith.constant dense<0.000000e+00> : vector<8x64xf32>
    %16 = tpu.matmul %14, %15, %cst_13 {dimension_numbers = #tpu.dot_dimension_numbers<[1], [0], [0], [1], [0, 0, 1, 1], [], []>} : vector<8x64xbf16>, vector<64x64xbf16>, vector<8x64xf32> -> vector<8x64xf32>
    %c0_14 = arith.constant 0 : index
    %c0_15 = arith.constant 0 : index
    %17 = vector.load %arg7[%c0_14, %c0_15] : memref<1x64xf32, #tpu.memory_space<vmem>>, vector<1x64xf32>
    %18 = vector.broadcast %17 : vector<1x64xf32> to vector<8x64xf32>
    %19 = arith.addf %16, %18 : vector<8x64xf32>
    %cst_16 = arith.constant 0.000000e+00 : f32
    %20 = vector.broadcast %cst_16 : f32 to vector<8x64xf32>
    %21 = arith.maximumf %19, %20 : vector<8x64xf32>
    %22 = arith.truncf %21 : vector<8x64xf32> to vector<8x64xbf16>
    %c0_17 = arith.constant 0 : index
    %c0_18 = arith.constant 0 : index
    %23 = vector.load %arg8[%c0_17, %c0_18] : memref<64x64xbf16, #tpu.memory_space<vmem>>, vector<64x64xbf16>
    %cst_19 = arith.constant dense<0.000000e+00> : vector<8x64xf32>
    %24 = tpu.matmul %22, %23, %cst_19 {dimension_numbers = #tpu.dot_dimension_numbers<[1], [0], [0], [1], [0, 0, 1, 1], [], []>} : vector<8x64xbf16>, vector<64x64xbf16>, vector<8x64xf32> -> vector<8x64xf32>
    %c0_20 = arith.constant 0 : index
    %c0_21 = arith.constant 0 : index
    %25 = vector.load %arg9[%c0_20, %c0_21] : memref<1x64xf32, #tpu.memory_space<vmem>>, vector<1x64xf32>
    %26 = vector.broadcast %25 : vector<1x64xf32> to vector<8x64xf32>
    %27 = arith.addf %24, %26 : vector<8x64xf32>
    %cst_22 = arith.constant 0.000000e+00 : f32
    %28 = vector.broadcast %cst_22 : f32 to vector<8x64xf32>
    %29 = arith.maximumf %27, %28 : vector<8x64xf32>
    %30 = arith.truncf %29 : vector<8x64xf32> to vector<8x64xbf16>
    %c0_23 = arith.constant 0 : index
    %c0_24 = arith.constant 0 : index
    %31 = vector.load %arg10[%c0_23, %c0_24] : memref<64x2xbf16, #tpu.memory_space<vmem>>, vector<64x2xbf16>
    %cst_25 = arith.constant dense<0.000000e+00> : vector<8x2xf32>
    %32 = tpu.matmul %30, %31, %cst_25 {dimension_numbers = #tpu.dot_dimension_numbers<[1], [0], [0], [1], [0, 0, 1, 1], [], []>} : vector<8x64xbf16>, vector<64x2xbf16>, vector<8x2xf32> -> vector<8x2xf32>
    %c0_26 = arith.constant 0 : index
    %c0_27 = arith.constant 0 : index
    %33 = vector.load %arg11[%c0_26, %c0_27] : memref<1x2xf32, #tpu.memory_space<vmem>>, vector<1x2xf32>
    %34 = vector.broadcast %33 : vector<1x2xf32> to vector<8x2xf32>
    %35 = arith.addf %32, %34 : vector<8x2xf32>
    %c0_28 = arith.constant 0 : index
    %c0_29 = arith.constant 0 : index
    %36 = vector.load %arg12[%c0_28, %c0_29] : memref<8x2xf32, #tpu.memory_space<vmem>>, vector<8x2xf32>
    tpu.vector_store %arg12[%c0_28, %c0_29], %35 {strides = array<i32>} : memref<8x2xf32, #tpu.memory_space<vmem>>, vector<8x2xf32>,
    return
  }
  func.func @transform_0(%arg0: i32) -> (i32, i32) {
    %c0_i32 = arith.constant 0 : i32
    %c0_i32_0 = arith.constant 0 : i32
    return %arg0, %c0_i32 : i32, i32
  }
  func.func @transform_1(%arg0: i32) -> (i32, i32) {
    %c0_i32 = arith.constant 0 : i32
    %c0_i32_0 = arith.constant 0 : i32
    return %arg0, %c0_i32 : i32, i32
  }
  func.func @transform_2(%arg0: i32) -> (i32, i32) {
    %c0_i32 = arith.constant 0 : i32
    %c0_i32_0 = arith.constant 0 : i32
    %c0_i32_1 = arith.constant 0 : i32
    return %c0_i32, %c0_i32_0 : i32, i32
  }
  func.func @transform_3(%arg0: i32) -> (i32, i32) {
    %c0_i32 = arith.constant 0 : i32
    %c0_i32_0 = arith.constant 0 : i32
    %c0_i32_1 = arith.constant 0 : i32
    return %c0_i32, %c0_i32_0 : i32, i32
  }
  func.func @transform_4(%arg0: i32) -> (i32, i32) {
    %c0_i32 = arith.constant 0 : i32
    %c0_i32_0 = arith.constant 0 : i32
    %c0_i32_1 = arith.constant 0 : i32
    return %c0_i32, %c0_i32_0 : i32, i32
  }
  func.func @transform_5(%arg0: i32) -> (i32, i32) {
    %c0_i32 = arith.constant 0 : i32
    %c0_i32_0 = arith.constant 0 : i32
    %c0_i32_1 = arith.constant 0 : i32
    return %c0_i32, %c0_i32_0 : i32, i32
  }
  func.func @transform_6(%arg0: i32) -> (i32, i32) {
    %c0_i32 = arith.constant 0 : i32
    %c0_i32_0 = arith.constant 0 : i32
    %c0_i32_1 = arith.constant 0 : i32
    return %c0_i32, %c0_i32_0 : i32, i32
  }
  func.func @transform_7(%arg0: i32) -> (i32, i32) {
    %c0_i32 = arith.constant 0 : i32
    %c0_i32_0 = arith.constant 0 : i32
    %c0_i32_1 = arith.constant 0 : i32
    return %c0_i32, %c0_i32_0 : i32, i32
  }
  func.func @transform_8(%arg0: i32) -> (i32, i32) {
    %c0_i32 = arith.constant 0 : i32
    %c0_i32_0 = arith.constant 0 : i32
    %c0_i32_1 = arith.constant 0 : i32
    return %c0_i32, %c0_i32_0 : i32, i32
  }
  func.func @transform_9(%arg0: i32) -> (i32, i32) {
    %c0_i32 = arith.constant 0 : i32
    %c0_i32_0 = arith.constant 0 : i32
    %c0_i32_1 = arith.constant 0 : i32
    return %c0_i32, %c0_i32_0 : i32, i32
  }
  func.func @transform_10(%arg0: i32) -> (i32, i32) {
    %c0_i32 = arith.constant 0 : i32
    %c0_i32_0 = arith.constant 0 : i32
    %c0_i32_1 = arith.constant 0 : i32
    return %c0_i32, %c0_i32_0 : i32, i32
  }
  func.func @transform_11(%arg0: i32) -> (i32, i32) {
    %c0_i32 = arith.constant 0 : i32
    %c0_i32_0 = arith.constant 0 : i32
    return %arg0, %c0_i32 : i32, i32
  }
}

</mosaic_0001>

<bundles_post_ra>
// kernel: tpu_custom_call.1
= control target key start
LH: loop header
LB: loop body
LE: loop exit
PB: predicated region body
PF: predicated region fallthrough
CT: control target
= control target key end

     0   :  { %s1542_s0 = inlined_call_operand.hbm [shape: f32[16,16], index: 0, kind: input, shape index: {}]   ;;  %s1543_s1 = inlined_call_operand.vmem [shape: f32[16,4], index: 1, kind: input, shape index: {}]   ;;  %s1544_s2 = inlined_call_operand.hbm [shape: bf16[16,64], index: 2, kind: input, shape index: {}]   ;;  %s1545_s3 = inlined_call_operand.hbm [shape: bf16[4,64], index: 3, kind: input, shape index: {}]   ;;  %s1546_s4 = inlined_call_operand.vmem [shape: f32[1,64], index: 4, kind: input, shape index: {}]   ;;  %s1547_s5 = inlined_call_operand.vmem [shape: bf16[64,64], index: 5, kind: input, shape index: {}]   ;;  %s1548_s6 = inlined_call_operand.vmem [shape: f32[1,64], index: 6, kind: input, shape index: {}]   ;;  %s1549_s7 = inlined_call_operand.vmem [shape: bf16[64,64], index: 7, kind: input, shape index: {}]   ;;  %s1550_s8 = inlined_call_operand.vmem [shape: f32[1,64], index: 8, kind: input, shape index: {}]   ;;  %s1551_s9 = inlined_call_operand.vmem [shape: bf16[64,2], index: 9, kind: input, shape index: {}]   ;;  %s1552_s10 = inlined_call_operand.vmem [shape: f32[1,2], index: 10, kind: input, shape index: {}]   ;;  %s1553_s11 = inlined_call_operand.vmem [shape: f32[16,2], index: 11, kind: output, shape index: {}]  }
   0x1   :  { %1557 = sst [smem:[#allocation9_spill]] %s1553_s11 }
   0x2   :  { %16 = vsyncpa [#allocation3], 0 }
   0x3   :  { %18 = vsyncpa [#allocation3 + $0x1], 0 }
   0x4   :  { %19 = vsyncpa [#allocation5], 0  ;;  %s1285_s17 = smov 0   ;;  %s1287_s18 = smov 0  }
   0x5   :  { %s1289_s19 = smov 0   ;;  %s1291_s20 = smov 0  }
   0x6 LB: > { %s1304_s21 = sadd.s32 4294967295, %s1216_s20   ;;  %p45_p0 = scmp.ne.s32.totalorder %s1208_s18, %s1204_s17  ;;  %s1216_s20 = sphi %s1291_s20, %s1570_s20   ;;  %s1212_s19 = sphi %s1289_s19, %s1569_s19   ;;  %s1208_s18 = sphi %s1287_s18, %s1568_s18   ;;  %s1204_s17 = sphi %s1285_s17, %s1567_s17  }
   0x7   : > { %p1554_p1 = scmp.eq.s32.totalorder %s1304_s21, 0  ;;  %p912_p2 = scmp.ge.s32.totalorder %s1216_s20, 1 }
   0x8   : > { %p297_p3 = scmp.lt.s32.totalorder %s1216_s20, 3  ;;  %s1218_s24 = smov [#allocation4]  }
   0x9   : > { %p1312_p4 = por %p1554_p1, %p45_p0  ;;  %s309_s25 = sshll.u32 %s1218_s24, 4  ;;  %s310_s25 = int_to_ptr.vmem [resolvable:$true] %s309_s25 }
   0xa   : > { %p1316_p5 = pnand %p912_p2, %p297_p3  ;;  %s1219_s27 = smov [#allocation6]  }
   0xb   : > { %s1558_s22 = scalar_select %p1312_p4, 1, 0 }
   0xc   : > { %s1559_s23 = scalar_select %p1316_p5, 1, 0 }
   0xd   : > { %p1025_p6 = pneg %p1316_p5  ;;  %s323_s28 = sshll.u32 %s1219_s27, 4  ;;  %s1328_s28 = int_to_ptr.vmem [resolvable:$true] %s323_s28 }
   0xe   : > { %s1092_s12 = scalar_lea.hbm %s1544_s2, 128 }
   0xf   : > { %p1324_p7 = pnand %p1025_p6, %p1554_p1  ;;  %p1093_p8 = scmp.ne.s32.totalorder %s1544_s2, %s1092_s12 }
  0x10   : > { %p1099_p12 = scmp.lt.u32.totalorder %s1092_s12, %s1544_s2 }
  0x11   : > { %p1094_p9 = pneg %p1324_p7 }
  0x13   : > { %p1095_p10 = pnand %p1094_p9, %p1093_p8 }
  0x15   : > { %p1096_p11 = pneg %p1095_p10 }
  0x17   : > { %p1101_p13 = pnand %p1099_p12, %p1096_p11 }
  0x19   : > { %1104 = shalt.err (!%p1101_p13)
}
  0x1a   : > { %s1105_s17 = scalar_lea.vmem %s310_s25, 128  ;;  %p1113_p6 = scmp.lt.s32.totalorder %s310_s25, %s310_s25 }
  0x1b   : > { %p1106_p0 = scmp.ne.s32.totalorder %s310_s25, %s1105_s17  ;;  %p1114_p1 = scmp.lt.s32.totalorder %s1105_s17, %s1105_s17 }
  0x1d   : > { %p1108_p2 = pnand %p1106_p0, %p1094_p9  ;;  %p1115_p4 = por %p1114_p1, %p1113_p6 }
  0x1f   : > { %p1109_p3 = pneg %p1108_p2 }
  0x21   : > { %p1116_p5 = pnand %p1115_p4, %p1109_p3 }
  0x23   : > { %1119 = shalt.err (!%p1116_p5)
}
  0x24   : > { %s1220_s24 = smov 64   ;;  %s1221_s27 = smov 4  }
  0x25   : > { %1028 = dma.hbm_to_vmem [thread:$0]  (!%p1324_p7), %s1544_s2, 128, %s310_s25, [#allocation5], %s1220_s24, %s1220_s24, %s1221_s27  }
  0x26   : > { %s1120_s14 = scalar_lea.hbm %s1545_s3, 32 }
  0x27   : > { %p1121_p8 = scmp.ne.s32.totalorder %s1545_s3, %s1120_s14  ;;  %p1127_p5 = scmp.lt.u32.totalorder %s1120_s14, %s1545_s3 }
  0x29   : > { %p1123_p1 = pnand %p1121_p8, %p1094_p9 }
  0x2b   : > { %p1124_p4 = pneg %p1123_p1 }
  0x2d   : > { %p1129_p10 = pnand %p1127_p5, %p1124_p4 }
  0x2f   : > { %1132 = shalt.err (!%p1129_p10)
}
  0x30   : > { %s1133_s25 = scalar_lea.vmem %s1328_s28, 32  ;;  %p1141_p0 = scmp.lt.s32.totalorder %s1328_s28, %s1328_s28 }
  0x31   : > { %p1134_p11 = scmp.ne.s32.totalorder %s1328_s28, %s1133_s25  ;;  %p1142_p2 = scmp.lt.s32.totalorder %s1133_s25, %s1133_s25 }
  0x33   : > { %p1136_p12 = pnand %p1134_p11, %p1094_p9  ;;  %p1143_p3 = por %p1142_p2, %p1141_p0 }
  0x35   : > { %p1137_p13 = pneg %p1136_p12 }
  0x37   : > { %p1144_p6 = pnand %p1143_p3, %p1137_p13 }
  0x39   : > { %1147 = shalt.err (!%p1144_p6)
}
  0x3a   : > { %1031 = dma.hbm_to_vmem [thread:$0]  (!%p1324_p7), %s1545_s3, 32, %s1328_s28, [#allocation5]  }
  0x3b   : > { %s1378_s27 = sadd.s32 1, %s1216_s20   ;;  %s32_s29 = sadd.s32 1, %s1212_s19 }
  0x3c   : > { %s29_s26 = ssub.s32 %s1216_s20, %s1378_s27  ;;  %p39_p9 = scmp.ne.s32.totalorder %s1212_s19, %s1208_s18 }
  0x3d   : > { %p30_p8 = scmp.eq.s32.totalorder %s29_s26, 0  ;;  %p40_p1 = scmp.eq.s32.totalorder %s1216_s20, 0 }
  0x3e   : > { %p1038_p4 = scmp.lt.s32.totalorder %s1216_s20, 2  ;;  %s355_s30 = sand.u32 1, %s1212_s19  }
  0x3f   : > { %s1389_s12 = scalar_select %p30_p8, %s1212_s19, %s32_s29  }
  0x40   : > { %p41_p5 = por %p40_p1, %p39_p9  ;;  %s916_s13 = sshll.u32 %s355_s30, 3 }
  0x41   : > { %s917_s14 = sshll.u32 %s1216_s20, 7  ;;  %s359_s28 = scalar_lea.vmem [#allocation2], %s916_s13 }
  0x42   : > { %s1395_s17 = scalar_lea.hbm %s1542_s0, %s917_s14  ;;  %s366_s25 = sshll.u32 %s359_s28, 4  ;;  %s1401_s25 = int_to_ptr.vmem [resolvable:$true] %s366_s25 }
  0x43   : > { %p1397_p7 = pnand %p1038_p4, %p41_p5  ;;  %s356_s20 = scalar_lea.sflag [#allocation3], %s355_s30 }
  0x44   : > { %s1148_s24 = scalar_lea.hbm %s1395_s17, 128  ;;  %s1153_s13 = scalar_lea.hbm %s1542_s0, 256 }
  0x45   : > { %p1149_p10 = scmp.ne.s32.totalorder %s1395_s17, %s1148_s24  ;;  %p1150_p11 = pneg %p1397_p7 }
  0x46   : > { %p1154_p0 = scmp.lt.u32.totalorder %s1395_s17, %s1542_s0  ;;  %p1155_p2 = scmp.lt.u32.totalorder %s1153_s13, %s1148_s24 }
  0x47   : > { %p1151_p12 = pnand %p1150_p11, %p1149_p10  ;;  %p1157_p6 = scmp.lt.u32.totalorder %s1148_s24, %s1395_s17 }
  0x48   : > { %p1156_p3 = por %p1155_p2, %p1154_p0 }
  0x49   : > { %p1152_p13 = pneg %p1151_p12 }
  0x4a   : > { %p1158_p9 = por %p1157_p6, %p1156_p3 }
  0x4c   : > { %p1159_p8 = pnand %p1158_p9, %p1152_p13 }
  0x4e   : > { %1162 = shalt.err (!%p1159_p8)
}
  0x4f   : > { %s1163_s30 = scalar_lea.vmem %s1401_s25, 128  ;;  %s1222_s16 = smov [#allocation2]  }
  0x50   : > { %p1164_p1 = scmp.ne.s32.totalorder %s1401_s25, %s1163_s30  ;;  %s1168_s28 = sshll.u32 %s1222_s16, 4  ;;  %s1169_s28 = int_to_ptr.vmem [resolvable:$false] %s1168_s28 }
  0x51   : > { %s1170_s29 = scalar_lea.vmem %s1169_s28, 256  ;;  %p1171_p10 = scmp.lt.s32.totalorder %s1401_s25, %s1169_s28 }
  0x52   : > { %p1166_p4 = pnand %p1164_p1, %p1150_p11  ;;  %p1172_p12 = scmp.lt.s32.totalorder %s1170_s29, %s1163_s30 }
  0x54   : > { %p1167_p5 = pneg %p1166_p4  ;;  %p1173_p0 = por %p1172_p12, %p1171_p10 }
  0x56   : > { %p1174_p2 = pnand %p1173_p0, %p1167_p5 }
  0x58   : > { %1177 = shalt.err (!%p1174_p2)
}
  0x59   : > { %1035 = dma.hbm_to_vmem [thread:$0]  (!%p1397_p7), %s1395_s17, 128, %s1401_s25, %s356_s20  }
  0x5a   : > { %p1562_p13 = scmp.ne.s32.totalorder %s1559_s23, 0 }
  0x5b   : > { %s384_s24 = sand.u32 (!%p1562_p13), 1, %s1208_s18   ;;  %p1563_p11 = scmp.ne.s32.totalorder (!%p1562_p13), %s1558_s22, 0 }
  0x5c   : > { %382 = sbr.rel (%p1562_p13) target bundleno = 990 (0x3de), region = 64  ;;  %s919_s26 = sshll.u32 (!%p1562_p13), %s384_s24, 3 }
  0x5d   : > { %s385_s13 = scalar_lea.sflag (!%p1562_p13), [#allocation3], %s384_s24  ;;  %s388_s14 = scalar_lea.vmem (!%p1562_p13), [#allocation2], %s919_s26 }
  0x63   : > { %1195 = dma.done.wait (%p1563_p11), %s385_s13, 128  }
  0x64   : > { %1197 = vsyncadd (%p1563_p11), %s385_s13, 4294967168  ;;  %p1564_p3 = scmp.eq.s32.totalorder %s1304_s21, 0 }
  0x66   : > { %1199 = dma.done.wait (%p1564_p3), [#allocation5], 160   ;;  %p1565_p6 = pmov %p1564_p3 }
  0x67   : > { %p438_p7 = scmp.lt.s32.totalorder %s1304_s21, 1  ;;  %v1223_v0 = vmov 0.0   ;;  %vm1224_vm0 = vmmov 0   ;;  %vm458_vm1 = vcmask 1041408   ;;  %v453_v1 = vld [vmem:[#allocation6] sm:$0x3] }
  0x68   : > { %1201 = vsyncadd (%p1565_p6), [#allocation5], 4294967136  ;;  %967 = vmatprep.subr.bf16.mxu1 %v1223_v0  ;;  %969 = vmatprep.mubr.msk.bf16.mxu1 %vm1224_vm0, %v1223_v0  ;;  %v460_v3 = vsel %vm458_vm1, %v453_v1, 0  ;;  %vm454_vm2 = vcmask 31744   ;;  %v1079_v5 = vld [vmem:[#allocation4] sm:$0xff]   ;;  %v447_v6 = vld [vmem:[%s388_s14] sm:$0xff] }
  0x69   : > { %s1572_s21 = smov (!%p438_p7, %s1304_s21), 1  ;;  %979 = vmatprep.subr.bf16.mxu0 %v1223_v0  ;;  %987 = vmatprep.mubr.msk.bf16.mxu0 %vm1224_vm0, %v1223_v0  ;;  %v448_v7 = vpack.c.bf16 %v447_v6, %v447_v6  ;;  %vm508_vm3 = vcmask 130048   ;;  %v1080_v8 = vld [vmem:[%s1547_s5] sm:$0xff]   ;;  %v1081_v9 = vld [vmem:[%s1547_s5 + $0x8] sm:$0xff]   ;;  %v1082_v10 = vld [vmem:[%s1547_s5 + $0x10] sm:$0xff]   ;;  %vm601_vm4 = vcmask 523264  }
  0x6a   : > { %s922_s22 = sshll.u32 %s1572_s21, 3  ;;  %968 = vmatpush3.bf16.msra.mxu1 %v460_v3  ;;  %980 = vmatpush3.bf16.msra.mxu0 %v1080_v8  ;;  %v1083_v11 = vld [vmem:[%s1547_s5 + $0x18] sm:$0xff]   ;;  %v1084_v12 = vld [vmem:[%s1549_s7] sm:$0xff]   ;;  %v1085_v13 = vld [vmem:[%s1549_s7 + $0x8] sm:$0xff]   ;;  %s1566_s29 = sld [smem:[#allocation9_spill]]  ;;  %vm813_vm5 = vcmask 15360  }
  0x6b   : > { %s441_s25 = scalar_lea.vmem %s1543_s1, %s922_s22  ;;  %973 = vmatprep.subr.bf16.mxu1 %v1223_v0  ;;  %981 = vmatprep.subr.bf16.mxu0 %v1223_v0  ;;  %v927_v19 = vld [vmem:[%s1546_s4] ss:$0 sm:$0xff]  ;;  %v1086_v27 = vld [vmem:[%s1549_s7 + $0x10] sm:$0xff]   ;;  %v1087_v28 = vld [vmem:[%s1549_s7 + $0x18] sm:$0xff]  }
  0x6c   : > { %v449_v2 = vld [vmem:[%s441_s25] sm:$0xff]  ;;  %v1089_v30 = vld [vmem:[%s1551_s9 + $0x8] sm:$0xff]   ;;  %v1090_v39 = vld [vmem:[%s1551_s9 + $0x10] sm:$0xff]  }
  0x6d   : > { %v450_v4 = vpack.c.bf16 %v449_v2, %v449_v2  ;;  %v1088_v29 = vld [vmem:[%s1551_s9] sm:$0xff]   ;;  %v1091_v40 = vld [vmem:[%s1551_s9 + $0x18] sm:$0xff]  }
  0x6e   : > { %982 = vmatpush3.bf16.msra.mxu0 %v1081_v9  ;;  %v928_v31 = vld [vmem:[%s1548_s6] ss:$0 sm:$0xff] }
  0x6f   : > { %970 = vmatmul.mubr.msk.bf16.vlgmr.msra.gmra.mrb[0].mxu1 %vm454_vm2, %v450_v4  ;;  %983 = vmatprep.subr.bf16.mxu0 %v1223_v0  ;;  %v934_v41 = vld [vmem:[%s1550_s8] ss:$0 sm:$0xff] }
  0x70   : > { %974 = vmatpush3.bf16.msra.mxu1 %v1079_v5  ;;  %975 = vmatprep.mubr.msk.bf16.mxu1 %vm1224_vm0, %v1223_v0  ;;  %v940_v49 = vld [vmem:[%s1552_s10] ss:$0 sm:$0xff]  ;;  %s445_s24 = scalar_lea.vmem %s1566_s29, %s922_s22 }
  0x71   : > { %991 = vmatprep.subr.bf16.mxu1 %v1223_v0 }
  0x72   : > { %984 = vmatpush3.bf16.msra.mxu0 %v1082_v10 }
  0x73   : > { %985 = vmatprep.subr.bf16.mxu0 %v1223_v0 }
  0x76   : > { %986 = vmatpush3.bf16.msra.mxu0 %v1083_v11 }
  0x77   : > { %976 = vmatmul.mubr.msk.bf16.vlgmr.msra.gmra.mrb[4].mxu1 %vm508_vm3, %v448_v7  ;;  %1003 = vmatprep.subr.bf16.mxu0 %v1223_v0 }
  0x78   : > { %999 = vmatprep.mubr.msk.bf16.mxu1 %vm1224_vm0, %v1223_v0  ;;  %992 = vmatpush3.bf16.msra.mxu1 %v1084_v12 }
  0x79   : > { %993 = vmatprep.subr.bf16.mxu1 %v1223_v0 }
  0x7c   : > { %994 = vmatpush3.bf16.msra.mxu1 %v1085_v13 }
  0x7d   : > { %995 = vmatprep.subr.bf16.mxu1 %v1223_v0 }
  0x80   : > { %996 = vmatpush3.bf16.msra.mxu1 %v1086_v27 }
  0x81   : > { %997 = vmatprep.subr.bf16.mxu1 %v1223_v0 }
  0x84   : > { %998 = vmatpush3.bf16.msra.mxu1 %v1087_v28 }
 0x142   : > { %v496_v14 = vpop.f32.mrb[0].mxu1 }
 0x143   : > { %v971_v15 = vpop.f32.mrb[1].mxu1 }
 0x144   : > { %v499_v16 = vpop.f32.mrb[2].mxu1 }
 0x145   : > { %v972_v17 = vpop.f32.mrb[3].mxu1 }
 0x14a   : > { %v546_v18 = vpop.f32.mrb[4].mxu1 }
 0x14b   : > { %v547_v20 = vadd.f32 %v546_v18, %v496_v14  ;;  %v977_v21 = vpop.f32.mrb[5].mxu1 }
 0x14c   : > { %v549_v22 = vpop.f32.mrb[6].mxu1 }
 0x14d   : > { %v559_v23 = vadd.f32 %v927_v19, %v547_v20  ;;  %v978_v24 = vpop.f32.mrb[7].mxu1 }
 0x14f   : > { %v560_v25 = vmax.f32 %v559_v23, 0.0 }
 0x151   : > { %v561_v26 = vpack.c.bf16 %v560_v25, %v560_v25 }
 0x153   : > { %988 = vmatmul.mubr.msk.bf16.vlgmr.msra.gmra.mrb[0].mxu0 %vm601_vm4, %v561_v26 }
 0x154   : > { %1011 = vmatprep.mubr.msk.bf16.mxu0 %vm1224_vm0, %v1223_v0  ;;  %1004 = vmatpush3.bf16.msra.mxu0 %v1088_v29 }
 0x155   : > { %1005 = vmatprep.subr.bf16.mxu0 %v1223_v0 }
 0x158   : > { %1006 = vmatpush3.bf16.msra.mxu0 %v1089_v30 }
 0x159   : > { %1007 = vmatprep.subr.bf16.mxu0 %v1223_v0 }
 0x15c   : > { %1008 = vmatpush3.bf16.msra.mxu0 %v1090_v39 }
 0x15d   : > { %1009 = vmatprep.subr.bf16.mxu0 %v1223_v0 }
 0x160   : > { %1010 = vmatpush3.bf16.msra.mxu0 %v1091_v40 }
 0x226   : > { %v639_v32 = vpop.f32.mrb[0].mxu0 }
 0x227   : > { %v640_v33 = vadd.f32 %v928_v31, %v639_v32  ;;  %v989_v34 = vpop.f32.mrb[1].mxu0 }
 0x228   : > { %v642_v35 = vpop.f32.mrb[2].mxu0 }
 0x229   : > { %v645_v36 = vmax.f32 %v640_v33, 0.0  ;;  %v990_v37 = vpop.f32.mrb[3].mxu0 }
 0x22b   : > { %v646_v38 = vpack.c.bf16 %v645_v36, %v645_v36 }
 0x22d   : > { %1000 = vmatmul.mubr.msk.bf16.vlgmr.msra.gmra.mrb[8].mxu1 %vm601_vm4, %v646_v38 }
 0x300   : > { %v723_v42 = vpop.f32.mrb[8].mxu1 }
 0x301   : > { %v724_v43 = vadd.f32 %v934_v41, %v723_v42  ;;  %v1001_v44 = vpop.f32.mrb[9].mxu1 }
 0x302   : > { %v726_v45 = vpop.f32.mrb[10].mxu1 }
 0x303   : > { %v729_v46 = vmax.f32 %v724_v43, 0.0  ;;  %v1002_v47 = vpop.f32.mrb[11].mxu1 }
 0x305   : > { %v730_v48 = vpack.c.bf16 %v729_v46, %v729_v46 }
 0x307   : > { %1012 = vmatmul.mubr.msk.bf16.vlgmr.msra.gmra.mrb[4].mxu0 %vm601_vm4, %v730_v48 }
 0x3da   : > { %v807_v50 = vpop.f32.mrb[4].mxu0 }
 0x3db   : > { %v808_v51 = vadd.f32 %v940_v49, %v807_v50  ;;  %v1013_v52 = vpop.f32.mrb[5].mxu0 }
 0x3dc   : > { %v810_v53 = vpop.f32.mrb[6].mxu0 }
 0x3dd   : > { %814 = vst.msk [vmem:[%s445_s24] sm:$0xff] %vm813_vm5, %v808_v51  ;;  %v1014_v54 = vpop.f32.mrb[7].mxu0 }
 0x3de PF: > { %p22_p9 = scmp.ge.s32.totalorder %s1378_s27, 4   ;;  %s1567_s17 = smov %s1208_s18 }
 0x3df   : > { %s1568_s18 = smov %s1212_s19  ;;  %s1569_s19 = smov %s1389_s12 }
 0x3e0   : > { %s1570_s20 = smov %s1378_s27  ;;  %24 = sbr.rel (!%p22_p9) target bundleno = 6 (0x6), region = 115 }
 0x3e7   :  { %834 = vsyncpa [#allocation3], 1 }
 0x3e8   :  { %836 = vsyncpa [#allocation3 + $0x1], 1 }
 0x3e9   :  { %837 = vsyncpa [#allocation5], 1 }

</bundles_post_ra>
